<compile_context>
chip_gen: v5e
topology: v5e:2x2
jax: 0.10.0
libtpu: 0.0.40
codegen_flags: <defaults>
</compile_context>

<pallas_src>
import functools

import jax
import jax.numpy as jnp
from jax.experimental import pallas as pl
from jax.experimental.pallas import tpu as pltpu


def _lstm_classifier_kernel(x_ref, w_ih_ref, w_hh_ref, b_ref, fc_w_ref,
                            fc_b_ref, out_ref, h_scr, c_scr, *, kt, bp, hidden):
    """One grid step = `kt` timesteps for the whole (padded) batch.

    x_ref      : (kt*bp, D) bf16, time-major rows (row = local_t * bp + b)
    w_ih_ref   : (D, 4H)    bf16
    w_hh_ref   : (H, 4H)    bf16
    b_ref      : (1, 4H)    f32   (b_ih + b_hh)
    fc_w_ref   : (1, H)     f32
    fc_b_ref   : (1, 1)     f32
    out_ref    : (bp, 1)    f32
    h_scr/c_scr: (bp, H)    f32   recurrent state carried across time chunks
    """
    H = hidden
    chunk = pl.program_id(0)

    @pl.when(chunk == 0)
    def _():
        h_scr[...] = jnp.zeros_like(h_scr)
        c_scr[...] = jnp.zeros_like(c_scr)

    # ---- Hoisted input projection: all kt timesteps in one MXU matmul ----
    # (kt*bp, D) @ (D, 4H) -> (kt*bp, 4H), f32 accumulation, + combined bias.
    gx = jnp.dot(x_ref[...], w_ih_ref[...],
                 preferred_element_type=jnp.float32) + b_ref[...]

    # ---- Sequential recurrence over the chunk (static, fully unrolled) ----
    w_hh = w_hh_ref[...]          # hoisted weight load (bf16)
    h = h_scr[...]                # (bp, H) f32
    c = c_scr[...]                # (bp, H) f32
    for k in range(kt):
        # Per-timestep gates: precomputed x-part + recurrent h-part.
        # gx slice is a static, 8-sublane-aligned, full-lane slice.
        g = gx[k * bp:(k + 1) * bp, :] + jnp.dot(
            h.astype(w_hh.dtype), w_hh, preferred_element_type=jnp.float32)
        # PyTorch gate order: input, forget, cell(g), output. 4H = 128-lane aligned.
        i_g = jax.nn.sigmoid(g[:, 0 * H:1 * H])
        f_g = jax.nn.sigmoid(g[:, 1 * H:2 * H])
        g_g = jnp.tanh(g[:, 2 * H:3 * H])
        o_g = jax.nn.sigmoid(g[:, 3 * H:4 * H])
        c = f_g * c + i_g * g_g
        h = o_g * jnp.tanh(c)

    h_scr[...] = h
    c_scr[...] = c

    # Final chunk: dropout is identity in eval mode, then fc + sigmoid.
    # fc is (H -> 1): VPU multiply + lane reduction instead of an N=1 MXU matmul.
    @pl.when(chunk == pl.num_programs(0) - 1)
    def _():
        logit = jnp.sum(h * fc_w_ref[...], axis=-1, keepdims=True) + fc_b_ref[...]
        out_ref[...] = jax.nn.sigmoid(logit).astype(out_ref.dtype)


def lstm_classifier_forward(x, w_ih, w_hh, b_ih, b_hh, fc_w, fc_b):
    """x: (B, T, D); weights in PyTorch layout:
       w_ih (4H, D), w_hh (4H, H), b_ih/b_hh (4H,), fc_w (1, H), fc_b (1,).
       Returns sigmoid(fc(h_T)) squeezed to shape (B,)."""
    B, T, D = x.shape
    H = w_hh.shape[1]

    # Pad batch to a multiple of 8 (f32 sublane count). Padded rows compute
    # garbage on zero inputs and are sliced off at the end.
    bp = ((B + 7) // 8) * 8

    # Timesteps fused per grid step (largest divisor of T up to 32).
    kt = max(d for d in range(1, min(T, 32) + 1) if T % d == 0)
    num_chunks = T // kt

    # Pre-transpose weights so all matmuls are x @ W; bf16 MXU inputs,
    # f32 accumulation. Bias / fc params stay f32.
    w_ih_t = jnp.asarray(w_ih, jnp.float32).T.astype(jnp.bfloat16)    # (D, 4H)
    w_hh_t = jnp.asarray(w_hh, jnp.float32).T.astype(jnp.bfloat16)    # (H, 4H)
    b = (jnp.asarray(b_ih, jnp.float32)
         + jnp.asarray(b_hh, jnp.float32))[None, :]                   # (1, 4H)
    fc_w_row = jnp.asarray(fc_w, jnp.float32).reshape(1, H)           # (1, H)
    fc_b2 = jnp.asarray(fc_b, jnp.float32).reshape(1, 1)              # (1, 1)

    # Time-major, batch-padded activation layout (single fused pad+layout pass;
    # this is what makes every per-timestep gate slice a contiguous aligned slab).
    x_bf = jnp.asarray(x, jnp.bfloat16)
    x_tbd = jnp.transpose(x_bf, (1, 0, 2))                            # (T, B, D)
    x_tbd = jnp.pad(x_tbd, ((0, 0), (0, bp - B), (0, 0)))             # (T, Bp, D)
    x_2d = x_tbd.reshape(T * bp, D)                                   # row = t*Bp + b

    kernel = functools.partial(_lstm_classifier_kernel, kt=kt, bp=bp, hidden=H)

    out = pl.pallas_call(
        kernel,
        out_shape=jax.ShapeDtypeStruct((bp, 1), jnp.float32),
        grid_spec=pltpu.PrefetchScalarGridSpec(
            num_scalar_prefetch=0,
            grid=(num_chunks,),
            in_specs=[
                pl.BlockSpec((kt * bp, D), lambda c: (c, 0)),   # x chunk (time-major)
                pl.BlockSpec((D, 4 * H), lambda c: (0, 0)),     # W_ih^T (resident)
                pl.BlockSpec((H, 4 * H), lambda c: (0, 0)),     # W_hh^T (resident)
                pl.BlockSpec((1, 4 * H), lambda c: (0, 0)),     # combined bias
                pl.BlockSpec((1, H), lambda c: (0, 0)),         # fc weight row
                pl.BlockSpec((1, 1), lambda c: (0, 0)),         # fc bias
            ],
            out_specs=pl.BlockSpec((bp, 1), lambda c: (0, 0)),
            scratch_shapes=[
                pltpu.VMEM((bp, H), jnp.float32),   # h state (f32)
                pltpu.VMEM((bp, H), jnp.float32),   # c state (f32)
            ],
        ),
        compiler_params=pltpu.CompilerParams(
            dimension_semantics=("arbitrary",)),   # time axis is sequential
    )(x_2d, w_ih_t, w_hh_t, b, fc_w_row, fc_b2)

    return out[:B, 0]   # matches torch .squeeze() for B > 1


def _reference_forward(x, w_ih, w_hh, b_ih, b_hh, fc_w, fc_b):
    """Pure-JAX f32 reference implementing PyTorch LSTM semantics."""
    B, T, D = x.shape
    H = w_hh.shape[1]
    h = jnp.zeros((B, H), jnp.float32)
    c = jnp.zeros((B, H), jnp.float32)
    for t in range(T):
        gates = x[:, t, :] @ w_ih.T + h @ w_hh.T + b_ih + b_hh
        i = jax.nn.sigmoid(gates[:, 0 * H:1 * H])
        f = jax.nn.sigmoid(gates[:, 1 * H:2 * H])
        g = jnp.tanh(gates[:, 2 * H:3 * H])
        o = jax.nn.sigmoid(gates[:, 3 * H:4 * H])
        c = f * c + i * g
        h = o * jnp.tanh(c)
    return jax.nn.sigmoid(h @ fc_w.T + fc_b)[:, 0]


if __name__ == "__main__":
    # Small shapes consistent with the module's forward.
    B, T, D, H = 2, 8, 16, 32

    key = jax.random.PRNGKey(0)
    ks = jax.random.split(key, 8)
    k_init = 1.0 / jnp.sqrt(H)

    def u(k, shape):
        return jax.random.uniform(k, shape, jnp.float32, -k_init, k_init)

    w_ih = u(ks[0], (4 * H, D))
    w_hh = u(ks[1], (4 * H, H))
    b_ih = u(ks[2], (4 * H,))
    b_hh = u(ks[3], (4 * H,))
    fc_w = u(ks[4], (1, H))
    fc_b = u(ks[5], (1,))
    x = jax.random.normal(ks[6], (B, T, D), jnp.float32)

    # NOTE: nn.Dropout(0.2) is identity in eval mode; training-mode dropout is
    # not modeled here (inference semantics).
    out = lstm_classifier_forward(x, w_ih, w_hh, b_ih, b_hh, fc_w, fc_b)
    out = jax.block_until_ready(out)

    ref = _reference_forward(x, w_ih, w_hh, b_ih, b_hh, fc_w, fc_b)
    assert out.shape == (B,)
    # Tolerance accounts for bf16 matmul inputs (f32 accumulation & elementwise).
    assert jnp.allclose(out, ref, atol=2e-2, rtol=2e-2), (out, ref)

    print("KERNEL_OK")
</pallas_src>

<mosaic_0001>
module attributes {stable_mosaic.version = 11 : i64} {
  func.func @_lstm_classifier_kernel(%arg0: i32, %arg1: memref<64x16xbf16, #tpu.memory_space<vmem>>, %arg2: memref<16x128xbf16, #tpu.memory_space<vmem>>, %arg3: memref<32x128xbf16, #tpu.memory_space<vmem>>, %arg4: memref<1x128xf32, #tpu.memory_space<vmem>>, %arg5: memref<1x32xf32, #tpu.memory_space<vmem>>, %arg6: memref<1x1xf32, #tpu.memory_space<vmem>>, %arg7: memref<8x1xf32, #tpu.memory_space<vmem>>, %arg8: memref<8x32xf32, #tpu.memory_space<vmem>>, %arg9: memref<8x32xf32, #tpu.memory_space<vmem>>) attributes {dimension_semantics = [#tpu.dimension_semantics<arbitrary>], iteration_bounds = array<i64: 1>, scalar_prefetch = 0 : i64, scratch_operands = 2 : i64, tpu.core_type = #tpu.core_type<tc>, window_params = [{transform_indices = @transform_0, window_bounds = array<i64: 64, 16>}, {pipeline_mode = #tpu.pipeline_mode<synchronous>, transform_indices = @transform_1, window_bounds = array<i64: 16, 128>}, {pipeline_mode = #tpu.pipeline_mode<synchronous>, transform_indices = @transform_2, window_bounds = array<i64: 32, 128>}, {pipeline_mode = #tpu.pipeline_mode<synchronous>, transform_indices = @transform_3, window_bounds = array<i64: 1, 128>}, {pipeline_mode = #tpu.pipeline_mode<synchronous>, transform_indices = @transform_4, window_bounds = array<i64: 1, 32>}, {pipeline_mode = #tpu.pipeline_mode<synchronous>, transform_indices = @transform_5, window_bounds = array<i64: 1, 1>}, {pipeline_mode = #tpu.pipeline_mode<synchronous>, transform_indices = @transform_6, window_bounds = array<i64: 8, 1>}]} {
    %c0_i32 = arith.constant 0 : i32
    %0 = arith.cmpi eq, %arg0, %c0_i32 : i32
    %1 = arith.extui %0 : i1 to i32
    %c0_i32_0 = arith.constant 0 : i32
    %2 = arith.cmpi ne, %1, %c0_i32_0 : i32
    scf.if %2 {
      %cst_50 = arith.constant 0.000000e+00 : f32
      %249 = vector.broadcast %cst_50 : f32 to vector<8x32xf32>
      %c0_51 = arith.constant 0 : index
      %c0_52 = arith.constant 0 : index
      %250 = vector.load %arg8[%c0_51, %c0_52] : memref<8x32xf32, #tpu.memory_space<vmem>>, vector<8x32xf32>
      tpu.vector_store %arg8[%c0_51, %c0_52], %249 {strides = array<i32>} : memref<8x32xf32, #tpu.memory_space<vmem>>, vector<8x32xf32>,
      %cst_53 = arith.constant 0.000000e+00 : f32
      %251 = vector.broadcast %cst_53 : f32 to vector<8x32xf32>
      %c0_54 = arith.constant 0 : index
      %c0_55 = arith.constant 0 : index
      %252 = vector.load %arg9[%c0_54, %c0_55] : memref<8x32xf32, #tpu.memory_space<vmem>>, vector<8x32xf32>
      tpu.vector_store %arg9[%c0_54, %c0_55], %251 {strides = array<i32>} : memref<8x32xf32, #tpu.memory_space<vmem>>, vector<8x32xf32>,
    } else {
    }
    %c0 = arith.constant 0 : index
    %c0_1 = arith.constant 0 : index
    %3 = vector.load %arg1[%c0, %c0_1] : memref<64x16xbf16, #tpu.memory_space<vmem>>, vector<64x16xbf16>
    %c0_2 = arith.constant 0 : index
    %c0_3 = arith.constant 0 : index
    %4 = vector.load %arg2[%c0_2, %c0_3] : memref<16x128xbf16, #tpu.memory_space<vmem>>, vector<16x128xbf16>
    %cst = arith.constant dense<0.000000e+00> : vector<64x128xf32>
    %5 = tpu.matmul %3, %4, %cst {dimension_numbers = #tpu.dot_dimension_numbers<[1], [0], [0], [1], [0, 0, 1, 1], [], []>} : vector<64x16xbf16>, vector<16x128xbf16>, vector<64x128xf32> -> vector<64x128xf32>
    %c0_4 = arith.constant 0 : index
    %c0_5 = arith.constant 0 : index
    %6 = vector.load %arg4[%c0_4, %c0_5] : memref<1x128xf32, #tpu.memory_space<vmem>>, vector<1x128xf32>
    %7 = vector.broadcast %6 : vector<1x128xf32> to vector<64x128xf32>
    %8 = arith.addf %5, %7 : vector<64x128xf32>
    %c0_6 = arith.constant 0 : index
    %c0_7 = arith.constant 0 : index
    %9 = vector.load %arg3[%c0_6, %c0_7] : memref<32x128xbf16, #tpu.memory_space<vmem>>, vector<32x128xbf16>
    %c0_8 = arith.constant 0 : index
    %c0_9 = arith.constant 0 : index
    %10 = vector.load %arg8[%c0_8, %c0_9] : memref<8x32xf32, #tpu.memory_space<vmem>>, vector<8x32xf32>
    %c0_10 = arith.constant 0 : index
    %c0_11 = arith.constant 0 : index
    %11 = vector.load %arg9[%c0_10, %c0_11] : memref<8x32xf32, #tpu.memory_space<vmem>>, vector<8x32xf32>
    %12 = vector.extract_strided_slice %8 {offsets = [0, 0], sizes = [8, 128], strides = [1, 1]} : vector<64x128xf32> to vector<8x128xf32>
    %13 = arith.truncf %10 : vector<8x32xf32> to vector<8x32xbf16>
    %cst_12 = arith.constant dense<0.000000e+00> : vector<8x128xf32>
    %14 = tpu.matmul %13, %9, %cst_12 {dimension_numbers = #tpu.dot_dimension_numbers<[1], [0], [0], [1], [0, 0, 1, 1], [], []>} : vector<8x32xbf16>, vector<32x128xbf16>, vector<8x128xf32> -> vector<8x128xf32>
    %15 = arith.addf %12, %14 : vector<8x128xf32>
    %16 = vector.extract_strided_slice %15 {offsets = [0, 0], sizes = [8, 32], strides = [1, 1]} : vector<8x128xf32> to vector<8x32xf32>
    %17 = arith.negf %16 : vector<8x32xf32>
    %18 = math.exp %17 : vector<8x32xf32>
    %cst_13 = arith.constant 1.000000e+00 : f32
    %19 = vector.broadcast %cst_13 : f32 to vector<8x32xf32>
    %20 = arith.addf %19, %18 : vector<8x32xf32>
    %21 = arith.divf %19, %20 : vector<8x32xf32>
    %22 = vector.extract_strided_slice %15 {offsets = [0, 32], sizes = [8, 32], strides = [1, 1]} : vector<8x128xf32> to vector<8x32xf32>
    %23 = arith.negf %22 : vector<8x32xf32>
    %24 = math.exp %23 : vector<8x32xf32>
    %cst_14 = arith.constant 1.000000e+00 : f32
    %25 = vector.broadcast %cst_14 : f32 to vector<8x32xf32>
    %26 = arith.addf %25, %24 : vector<8x32xf32>
    %27 = arith.divf %25, %26 : vector<8x32xf32>
    %28 = vector.extract_strided_slice %15 {offsets = [0, 64], sizes = [8, 32], strides = [1, 1]} : vector<8x128xf32> to vector<8x32xf32>
    %29 = math.tanh %28 : vector<8x32xf32>
    %30 = vector.extract_strided_slice %15 {offsets = [0, 96], sizes = [8, 32], strides = [1, 1]} : vector<8x128xf32> to vector<8x32xf32>
    %31 = arith.negf %30 : vector<8x32xf32>
    %32 = math.exp %31 : vector<8x32xf32>
    %cst_15 = arith.constant 1.000000e+00 : f32
    %33 = vector.broadcast %cst_15 : f32 to vector<8x32xf32>
    %34 = arith.addf %33, %32 : vector<8x32xf32>
    %35 = arith.divf %33, %34 : vector<8x32xf32>
    %36 = arith.mulf %27, %11 : vector<8x32xf32>
    %37 = arith.mulf %21, %29 : vector<8x32xf32>
    %38 = arith.addf %36, %37 : vector<8x32xf32>
    %39 = math.tanh %38 : vector<8x32xf32>
    %40 = arith.mulf %35, %39 : vector<8x32xf32>
    %41 = vector.extract_strided_slice %8 {offsets = [8, 0], sizes = [8, 128], strides = [1, 1]} : vector<64x128xf32> to vector<8x128xf32>
    %42 = arith.truncf %40 : vector<8x32xf32> to vector<8x32xbf16>
    %cst_16 = arith.constant dense<0.000000e+00> : vector<8x128xf32>
    %43 = tpu.matmul %42, %9, %cst_16 {dimension_numbers = #tpu.dot_dimension_numbers<[1], [0], [0], [1], [0, 0, 1, 1], [], []>} : vector<8x32xbf16>, vector<32x128xbf16>, vector<8x128xf32> -> vector<8x128xf32>
    %44 = arith.addf %41, %43 : vector<8x128xf32>
    %45 = vector.extract_strided_slice %44 {offsets = [0, 0], sizes = [8, 32], strides = [1, 1]} : vector<8x128xf32> to vector<8x32xf32>
    %46 = arith.negf %45 : vector<8x32xf32>
    %47 = math.exp %46 : vector<8x32xf32>
    %cst_17 = arith.constant 1.000000e+00 : f32
    %48 = vector.broadcast %cst_17 : f32 to vector<8x32xf32>
    %49 = arith.addf %48, %47 : vector<8x32xf32>
    %50 = arith.divf %48, %49 : vector<8x32xf32>
    %51 = vector.extract_strided_slice %44 {offsets = [0, 32], sizes = [8, 32], strides = [1, 1]} : vector<8x128xf32> to vector<8x32xf32>
    %52 = arith.negf %51 : vector<8x32xf32>
    %53 = math.exp %52 : vector<8x32xf32>
    %cst_18 = arith.constant 1.000000e+00 : f32
    %54 = vector.broadcast %cst_18 : f32 to vector<8x32xf32>
    %55 = arith.addf %54, %53 : vector<8x32xf32>
    %56 = arith.divf %54, %55 : vector<8x32xf32>
    %57 = vector.extract_strided_slice %44 {offsets = [0, 64], sizes = [8, 32], strides = [1, 1]} : vector<8x128xf32> to vector<8x32xf32>
    %58 = math.tanh %57 : vector<8x32xf32>
    %59 = vector.extract_strided_slice %44 {offsets = [0, 96], sizes = [8, 32], strides = [1, 1]} : vector<8x128xf32> to vector<8x32xf32>
    %60 = arith.negf %59 : vector<8x32xf32>
    %61 = math.exp %60 : vector<8x32xf32>
    %cst_19 = arith.constant 1.000000e+00 : f32
    %62 = vector.broadcast %cst_19 : f32 to vector<8x32xf32>
    %63 = arith.addf %62, %61 : vector<8x32xf32>
    %64 = arith.divf %62, %63 : vector<8x32xf32>
    %65 = arith.mulf %56, %38 : vector<8x32xf32>
    %66 = arith.mulf %50, %58 : vector<8x32xf32>
    %67 = arith.addf %65, %66 : vector<8x32xf32>
    %68 = math.tanh %67 : vector<8x32xf32>
    %69 = arith.mulf %64, %68 : vector<8x32xf32>
    %70 = vector.extract_strided_slice %8 {offsets = [16, 0], sizes = [8, 128], strides = [1, 1]} : vector<64x128xf32> to vector<8x128xf32>
    %71 = arith.truncf %69 : vector<8x32xf32> to vector<8x32xbf16>
    %cst_20 = arith.constant dense<0.000000e+00> : vector<8x128xf32>
    %72 = tpu.matmul %71, %9, %cst_20 {dimension_numbers = #tpu.dot_dimension_numbers<[1], [0], [0], [1], [0, 0, 1, 1], [], []>} : vector<8x32xbf16>, vector<32x128xbf16>, vector<8x128xf32> -> vector<8x128xf32>
    %73 = arith.addf %70, %72 : vector<8x128xf32>
    %74 = vector.extract_strided_slice %73 {offsets = [0, 0], sizes = [8, 32], strides = [1, 1]} : vector<8x128xf32> to vector<8x32xf32>
    %75 = arith.negf %74 : vector<8x32xf32>
    %76 = math.exp %75 : vector<8x32xf32>
    %cst_21 = arith.constant 1.000000e+00 : f32
    %77 = vector.broadcast %cst_21 : f32 to vector<8x32xf32>
    %78 = arith.addf %77, %76 : vector<8x32xf32>
    %79 = arith.divf %77, %78 : vector<8x32xf32>
    %80 = vector.extract_strided_slice %73 {offsets = [0, 32], sizes = [8, 32], strides = [1, 1]} : vector<8x128xf32> to vector<8x32xf32>
    %81 = arith.negf %80 : vector<8x32xf32>
    %82 = math.exp %81 : vector<8x32xf32>
    %cst_22 = arith.constant 1.000000e+00 : f32
    %83 = vector.broadcast %cst_22 : f32 to vector<8x32xf32>
    %84 = arith.addf %83, %82 : vector<8x32xf32>
    %85 = arith.divf %83, %84 : vector<8x32xf32>
    %86 = vector.extract_strided_slice %73 {offsets = [0, 64], sizes = [8, 32], strides = [1, 1]} : vector<8x128xf32> to vector<8x32xf32>
    %87 = math.tanh %86 : vector<8x32xf32>
    %88 = vector.extract_strided_slice %73 {offsets = [0, 96], sizes = [8, 32], strides = [1, 1]} : vector<8x128xf32> to vector<8x32xf32>
    %89 = arith.negf %88 : vector<8x32xf32>
    %90 = math.exp %89 : vector<8x32xf32>
    %cst_23 = arith.constant 1.000000e+00 : f32
    %91 = vector.broadcast %cst_23 : f32 to vector<8x32xf32>
    %92 = arith.addf %91, %90 : vector<8x32xf32>
    %93 = arith.divf %91, %92 : vector<8x32xf32>
    %94 = arith.mulf %85, %67 : vector<8x32xf32>
    %95 = arith.mulf %79, %87 : vector<8x32xf32>
    %96 = arith.addf %94, %95 : vector<8x32xf32>
    %97 = math.tanh %96 : vector<8x32xf32>
    %98 = arith.mulf %93, %97 : vector<8x32xf32>
    %99 = vector.extract_strided_slice %8 {offsets = [24, 0], sizes = [8, 128], strides = [1, 1]} : vector<64x128xf32> to vector<8x128xf32>
    %100 = arith.truncf %98 : vector<8x32xf32> to vector<8x32xbf16>
    %cst_24 = arith.constant dense<0.000000e+00> : vector<8x128xf32>
    %101 = tpu.matmul %100, %9, %cst_24 {dimension_numbers = #tpu.dot_dimension_numbers<[1], [0], [0], [1], [0, 0, 1, 1], [], []>} : vector<8x32xbf16>, vector<32x128xbf16>, vector<8x128xf32> -> vector<8x128xf32>
    %102 = arith.addf %99, %101 : vector<8x128xf32>
    %103 = vector.extract_strided_slice %102 {offsets = [0, 0], sizes = [8, 32], strides = [1, 1]} : vector<8x128xf32> to vector<8x32xf32>
    %104 = arith.negf %103 : vector<8x32xf32>
    %105 = math.exp %104 : vector<8x32xf32>
    %cst_25 = arith.constant 1.000000e+00 : f32
    %106 = vector.broadcast %cst_25 : f32 to vector<8x32xf32>
    %107 = arith.addf %106, %105 : vector<8x32xf32>
    %108 = arith.divf %106, %107 : vector<8x32xf32>
    %109 = vector.extract_strided_slice %102 {offsets = [0, 32], sizes = [8, 32], strides = [1, 1]} : vector<8x128xf32> to vector<8x32xf32>
    %110 = arith.negf %109 : vector<8x32xf32>
    %111 = math.exp %110 : vector<8x32xf32>
    %cst_26 = arith.constant 1.000000e+00 : f32
    %112 = vector.broadcast %cst_26 : f32 to vector<8x32xf32>
    %113 = arith.addf %112, %111 : vector<8x32xf32>
    %114 = arith.divf %112, %113 : vector<8x32xf32>
    %115 = vector.extract_strided_slice %102 {offsets = [0, 64], sizes = [8, 32], strides = [1, 1]} : vector<8x128xf32> to vector<8x32xf32>
    %116 = math.tanh %115 : vector<8x32xf32>
    %117 = vector.extract_strided_slice %102 {offsets = [0, 96], sizes = [8, 32], strides = [1, 1]} : vector<8x128xf32> to vector<8x32xf32>
    %118 = arith.negf %117 : vector<8x32xf32>
    %119 = math.exp %118 : vector<8x32xf32>
    %cst_27 = arith.constant 1.000000e+00 : f32
    %120 = vector.broadcast %cst_27 : f32 to vector<8x32xf32>
    %121 = arith.addf %120, %119 : vector<8x32xf32>
    %122 = arith.divf %120, %121 : vector<8x32xf32>
    %123 = arith.mulf %114, %96 : vector<8x32xf32>
    %124 = arith.mulf %108, %116 : vector<8x32xf32>
    %125 = arith.addf %123, %124 : vector<8x32xf32>
    %126 = math.tanh %125 : vector<8x32xf32>
    %127 = arith.mulf %122, %126 : vector<8x32xf32>
    %128 = vector.extract_strided_slice %8 {offsets = [32, 0], sizes = [8, 128], strides = [1, 1]} : vector<64x128xf32> to vector<8x128xf32>
    %129 = arith.truncf %127 : vector<8x32xf32> to vector<8x32xbf16>
    %cst_28 = arith.constant dense<0.000000e+00> : vector<8x128xf32>
    %130 = tpu.matmul %129, %9, %cst_28 {dimension_numbers = #tpu.dot_dimension_numbers<[1], [0], [0], [1], [0, 0, 1, 1], [], []>} : vector<8x32xbf16>, vector<32x128xbf16>, vector<8x128xf32> -> vector<8x128xf32>
    %131 = arith.addf %128, %130 : vector<8x128xf32>
    %132 = vector.extract_strided_slice %131 {offsets = [0, 0], sizes = [8, 32], strides = [1, 1]} : vector<8x128xf32> to vector<8x32xf32>
    %133 = arith.negf %132 : vector<8x32xf32>
    %134 = math.exp %133 : vector<8x32xf32>
    %cst_29 = arith.constant 1.000000e+00 : f32
    %135 = vector.broadcast %cst_29 : f32 to vector<8x32xf32>
    %136 = arith.addf %135, %134 : vector<8x32xf32>
    %137 = arith.divf %135, %136 : vector<8x32xf32>
    %138 = vector.extract_strided_slice %131 {offsets = [0, 32], sizes = [8, 32], strides = [1, 1]} : vector<8x128xf32> to vector<8x32xf32>
    %139 = arith.negf %138 : vector<8x32xf32>
    %140 = math.exp %139 : vector<8x32xf32>
    %cst_30 = arith.constant 1.000000e+00 : f32
    %141 = vector.broadcast %cst_30 : f32 to vector<8x32xf32>
    %142 = arith.addf %141, %140 : vector<8x32xf32>
    %143 = arith.divf %141, %142 : vector<8x32xf32>
    %144 = vector.extract_strided_slice %131 {offsets = [0, 64], sizes = [8, 32], strides = [1, 1]} : vector<8x128xf32> to vector<8x32xf32>
    %145 = math.tanh %144 : vector<8x32xf32>
    %146 = vector.extract_strided_slice %131 {offsets = [0, 96], sizes = [8, 32], strides = [1, 1]} : vector<8x128xf32> to vector<8x32xf32>
    %147 = arith.negf %146 : vector<8x32xf32>
    %148 = math.exp %147 : vector<8x32xf32>
    %cst_31 = arith.constant 1.000000e+00 : f32
    %149 = vector.broadcast %cst_31 : f32 to vector<8x32xf32>
    %150 = arith.addf %149, %148 : vector<8x32xf32>
    %151 = arith.divf %149, %150 : vector<8x32xf32>
    %152 = arith.mulf %143, %125 : vector<8x32xf32>
    %153 = arith.mulf %137, %145 : vector<8x32xf32>
    %154 = arith.addf %152, %153 : vector<8x32xf32>
    %155 = math.tanh %154 : vector<8x32xf32>
    %156 = arith.mulf %151, %155 : vector<8x32xf32>
    %157 = vector.extract_strided_slice %8 {offsets = [40, 0], sizes = [8, 128], strides = [1, 1]} : vector<64x128xf32> to vector<8x128xf32>
    %158 = arith.truncf %156 : vector<8x32xf32> to vector<8x32xbf16>
    %cst_32 = arith.constant dense<0.000000e+00> : vector<8x128xf32>
    %159 = tpu.matmul %158, %9, %cst_32 {dimension_numbers = #tpu.dot_dimension_numbers<[1], [0], [0], [1], [0, 0, 1, 1], [], []>} : vector<8x32xbf16>, vector<32x128xbf16>, vector<8x128xf32> -> vector<8x128xf32>
    %160 = arith.addf %157, %159 : vector<8x128xf32>
    %161 = vector.extract_strided_slice %160 {offsets = [0, 0], sizes = [8, 32], strides = [1, 1]} : vector<8x128xf32> to vector<8x32xf32>
    %162 = arith.negf %161 : vector<8x32xf32>
    %163 = math.exp %162 : vector<8x32xf32>
    %cst_33 = arith.constant 1.000000e+00 : f32
    %164 = vector.broadcast %cst_33 : f32 to vector<8x32xf32>
    %165 = arith.addf %164, %163 : vector<8x32xf32>
    %166 = arith.divf %164, %165 : vector<8x32xf32>
    %167 = vector.extract_strided_slice %160 {offsets = [0, 32], sizes = [8, 32], strides = [1, 1]} : vector<8x128xf32> to vector<8x32xf32>
    %168 = arith.negf %167 : vector<8x32xf32>
    %169 = math.exp %168 : vector<8x32xf32>
    %cst_34 = arith.constant 1.000000e+00 : f32
    %170 = vector.broadcast %cst_34 : f32 to vector<8x32xf32>
    %171 = arith.addf %170, %169 : vector<8x32xf32>
    %172 = arith.divf %170, %171 : vector<8x32xf32>
    %173 = vector.extract_strided_slice %160 {offsets = [0, 64], sizes = [8, 32], strides = [1, 1]} : vector<8x128xf32> to vector<8x32xf32>
    %174 = math.tanh %173 : vector<8x32xf32>
    %175 = vector.extract_strided_slice %160 {offsets = [0, 96], sizes = [8, 32], strides = [1, 1]} : vector<8x128xf32> to vector<8x32xf32>
    %176 = arith.negf %175 : vector<8x32xf32>
    %177 = math.exp %176 : vector<8x32xf32>
    %cst_35 = arith.constant 1.000000e+00 : f32
    %178 = vector.broadcast %cst_35 : f32 to vector<8x32xf32>
    %179 = arith.addf %178, %177 : vector<8x32xf32>
    %180 = arith.divf %178, %179 : vector<8x32xf32>
    %181 = arith.mulf %172, %154 : vector<8x32xf32>
    %182 = arith.mulf %166, %174 : vector<8x32xf32>
    %183 = arith.addf %181, %182 : vector<8x32xf32>
    %184 = math.tanh %183 : vector<8x32xf32>
    %185 = arith.mulf %180, %184 : vector<8x32xf32>
    %186 = vector.extract_strided_slice %8 {offsets = [48, 0], sizes = [8, 128], strides = [1, 1]} : vector<64x128xf32> to vector<8x128xf32>
    %187 = arith.truncf %185 : vector<8x32xf32> to vector<8x32xbf16>
    %cst_36 = arith.constant dense<0.000000e+00> : vector<8x128xf32>
    %188 = tpu.matmul %187, %9, %cst_36 {dimension_numbers = #tpu.dot_dimension_numbers<[1], [0], [0], [1], [0, 0, 1, 1], [], []>} : vector<8x32xbf16>, vector<32x128xbf16>, vector<8x128xf32> -> vector<8x128xf32>
    %189 = arith.addf %186, %188 : vector<8x128xf32>
    %190 = vector.extract_strided_slice %189 {offsets = [0, 0], sizes = [8, 32], strides = [1, 1]} : vector<8x128xf32> to vector<8x32xf32>
    %191 = arith.negf %190 : vector<8x32xf32>
    %192 = math.exp %191 : vector<8x32xf32>
    %cst_37 = arith.constant 1.000000e+00 : f32
    %193 = vector.broadcast %cst_37 : f32 to vector<8x32xf32>
    %194 = arith.addf %193, %192 : vector<8x32xf32>
    %195 = arith.divf %193, %194 : vector<8x32xf32>
    %196 = vector.extract_strided_slice %189 {offsets = [0, 32], sizes = [8, 32], strides = [1, 1]} : vector<8x128xf32> to vector<8x32xf32>
    %197 = arith.negf %196 : vector<8x32xf32>
    %198 = math.exp %197 : vector<8x32xf32>
    %cst_38 = arith.constant 1.000000e+00 : f32
    %199 = vector.broadcast %cst_38 : f32 to vector<8x32xf32>
    %200 = arith.addf %199, %198 : vector<8x32xf32>
    %201 = arith.divf %199, %200 : vector<8x32xf32>
    %202 = vector.extract_strided_slice %189 {offsets = [0, 64], sizes = [8, 32], strides = [1, 1]} : vector<8x128xf32> to vector<8x32xf32>
    %203 = math.tanh %202 : vector<8x32xf32>
    %204 = vector.extract_strided_slice %189 {offsets = [0, 96], sizes = [8, 32], strides = [1, 1]} : vector<8x128xf32> to vector<8x32xf32>
    %205 = arith.negf %204 : vector<8x32xf32>
    %206 = math.exp %205 : vector<8x32xf32>
    %cst_39 = arith.constant 1.000000e+00 : f32
    %207 = vector.broadcast %cst_39 : f32 to vector<8x32xf32>
    %208 = arith.addf %207, %206 : vector<8x32xf32>
    %209 = arith.divf %207, %208 : vector<8x32xf32>
    %210 = arith.mulf %201, %183 : vector<8x32xf32>
    %211 = arith.mulf %195, %203 : vector<8x32xf32>
    %212 = arith.addf %210, %211 : vector<8x32xf32>
    %213 = math.tanh %212 : vector<8x32xf32>
    %214 = arith.mulf %209, %213 : vector<8x32xf32>
    %215 = vector.extract_strided_slice %8 {offsets = [56, 0], sizes = [8, 128], strides = [1, 1]} : vector<64x128xf32> to vector<8x128xf32>
    %216 = arith.truncf %214 : vector<8x32xf32> to vector<8x32xbf16>
    %cst_40 = arith.constant dense<0.000000e+00> : vector<8x128xf32>
    %217 = tpu.matmul %216, %9, %cst_40 {dimension_numbers = #tpu.dot_dimension_numbers<[1], [0], [0], [1], [0, 0, 1, 1], [], []>} : vector<8x32xbf16>, vector<32x128xbf16>, vector<8x128xf32> -> vector<8x128xf32>
    %218 = arith.addf %215, %217 : vector<8x128xf32>
    %219 = vector.extract_strided_slice %218 {offsets = [0, 0], sizes = [8, 32], strides = [1, 1]} : vector<8x128xf32> to vector<8x32xf32>
    %220 = arith.negf %219 : vector<8x32xf32>
    %221 = math.exp %220 : vector<8x32xf32>
    %cst_41 = arith.constant 1.000000e+00 : f32
    %222 = vector.broadcast %cst_41 : f32 to vector<8x32xf32>
    %223 = arith.addf %222, %221 : vector<8x32xf32>
    %224 = arith.divf %222, %223 : vector<8x32xf32>
    %225 = vector.extract_strided_slice %218 {offsets = [0, 32], sizes = [8, 32], strides = [1, 1]} : vector<8x128xf32> to vector<8x32xf32>
    %226 = arith.negf %225 : vector<8x32xf32>
    %227 = math.exp %226 : vector<8x32xf32>
    %cst_42 = arith.constant 1.000000e+00 : f32
    %228 = vector.broadcast %cst_42 : f32 to vector<8x32xf32>
    %229 = arith.addf %228, %227 : vector<8x32xf32>
    %230 = arith.divf %228, %229 : vector<8x32xf32>
    %231 = vector.extract_strided_slice %218 {offsets = [0, 64], sizes = [8, 32], strides = [1, 1]} : vector<8x128xf32> to vector<8x32xf32>
    %232 = math.tanh %231 : vector<8x32xf32>
    %233 = vector.extract_strided_slice %218 {offsets = [0, 96], sizes = [8, 32], strides = [1, 1]} : vector<8x128xf32> to vector<8x32xf32>
    %234 = arith.negf %233 : vector<8x32xf32>
    %235 = math.exp %234 : vector<8x32xf32>
    %cst_43 = arith.constant 1.000000e+00 : f32
    %236 = vector.broadcast %cst_43 : f32 to vector<8x32xf32>
    %237 = arith.addf %236, %235 : vector<8x32xf32>
    %238 = arith.divf %236, %237 : vector<8x32xf32>
    %239 = arith.mulf %230, %212 : vector<8x32xf32>
    %240 = arith.mulf %224, %232 : vector<8x32xf32>
    %241 = arith.addf %239, %240 : vector<8x32xf32>
    %242 = math.tanh %241 : vector<8x32xf32>
    %243 = arith.mulf %238, %242 : vector<8x32xf32>
    %c0_44 = arith.constant 0 : index
    %c0_45 = arith.constant 0 : index
    %244 = vector.load %arg8[%c0_44, %c0_45] : memref<8x32xf32, #tpu.memory_space<vmem>>, vector<8x32xf32>
    tpu.vector_store %arg8[%c0_44, %c0_45], %243 {strides = array<i32>} : memref<8x32xf32, #tpu.memory_space<vmem>>, vector<8x32xf32>,
    %c0_46 = arith.constant 0 : index
    %c0_47 = arith.constant 0 : index
    %245 = vector.load %arg9[%c0_46, %c0_47] : memref<8x32xf32, #tpu.memory_space<vmem>>, vector<8x32xf32>
    tpu.vector_store %arg9[%c0_46, %c0_47], %241 {strides = array<i32>} : memref<8x32xf32, #tpu.memory_space<vmem>>, vector<8x32xf32>,
    %c0_i32_48 = arith.constant 0 : i32
    %246 = arith.cmpi eq, %arg0, %c0_i32_48 : i32
    %247 = arith.extui %246 : i1 to i32
    %c0_i32_49 = arith.constant 0 : i32
    %248 = arith.cmpi ne, %247, %c0_i32_49 : i32
    scf.if %248 {
      %c0_50 = arith.constant 0 : index
      %c0_51 = arith.constant 0 : index
      %249 = vector.load %arg5[%c0_50, %c0_51] : memref<1x32xf32, #tpu.memory_space<vmem>>, vector<1x32xf32>
      %250 = vector.broadcast %249 : vector<1x32xf32> to vector<8x32xf32>
      %251 = arith.mulf %243, %250 : vector<8x32xf32>
      %cst_52 = arith.constant dense<0.000000e+00> : vector<8xf32>
      %252 = vector.multi_reduction <add>, %251, %cst_52 [1] : vector<8x32xf32> to vector<8xf32>
      %253 = vector.shape_cast %252 : vector<8xf32> to vector<8x1xf32>
      %c0_53 = arith.constant 0 : index
      %c0_54 = arith.constant 0 : index
      %254 = vector.load %arg6[%c0_53, %c0_54] : memref<1x1xf32, #tpu.memory_space<vmem>>, vector<1x1xf32>
      %255 = vector.broadcast %254 : vector<1x1xf32> to vector<8x1xf32>
      %256 = arith.addf %253, %255 : vector<8x1xf32>
      %257 = arith.negf %256 : vector<8x1xf32>
      %258 = math.exp %257 : vector<8x1xf32>
      %cst_55 = arith.constant 1.000000e+00 : f32
      %259 = vector.broadcast %cst_55 : f32 to vector<8x1xf32>
      %260 = arith.addf %259, %258 : vector<8x1xf32>
      %261 = arith.divf %259, %260 : vector<8x1xf32>
      %c0_56 = arith.constant 0 : index
      %c0_57 = arith.constant 0 : index
      %262 = vector.load %arg7[%c0_56, %c0_57] : memref<8x1xf32, #tpu.memory_space<vmem>>, vector<8x1xf32>
      tpu.vector_store %arg7[%c0_56, %c0_57], %261 {strides = array<i32>} : memref<8x1xf32, #tpu.memory_space<vmem>>, vector<8x1xf32>,
    } else {
    }
    return
  }
  func.func @transform_0(%arg0: i32) -> (i32, i32) {
    %c0_i32 = arith.constant 0 : i32
    %c0_i32_0 = arith.constant 0 : i32
    return %arg0, %c0_i32 : i32, i32
  }
  func.func @transform_1(%arg0: i32) -> (i32, i32) {
    %c0_i32 = arith.constant 0 : i32
    %c0_i32_0 = arith.constant 0 : i32
    %c0_i32_1 = arith.constant 0 : i32
    return %c0_i32, %c0_i32_0 : i32, i32
  }
  func.func @transform_2(%arg0: i32) -> (i32, i32) {
    %c0_i32 = arith.constant 0 : i32
    %c0_i32_0 = arith.constant 0 : i32
    %c0_i32_1 = arith.constant 0 : i32
    return %c0_i32, %c0_i32_0 : i32, i32
  }
  func.func @transform_3(%arg0: i32) -> (i32, i32) {
    %c0_i32 = arith.constant 0 : i32
    %c0_i32_0 = arith.constant 0 : i32
    %c0_i32_1 = arith.constant 0 : i32
    return %c0_i32, %c0_i32_0 : i32, i32
  }
  func.func @transform_4(%arg0: i32) -> (i32, i32) {
    %c0_i32 = arith.constant 0 : i32
    %c0_i32_0 = arith.constant 0 : i32
    %c0_i32_1 = arith.constant 0 : i32
    return %c0_i32, %c0_i32_0 : i32, i32
  }
  func.func @transform_5(%arg0: i32) -> (i32, i32) {
    %c0_i32 = arith.constant 0 : i32
    %c0_i32_0 = arith.constant 0 : i32
    %c0_i32_1 = arith.constant 0 : i32
    return %c0_i32, %c0_i32_0 : i32, i32
  }
  func.func @transform_6(%arg0: i32) -> (i32, i32) {
    %c0_i32 = arith.constant 0 : i32
    %c0_i32_0 = arith.constant 0 : i32
    %c0_i32_1 = arith.constant 0 : i32
    return %c0_i32, %c0_i32_0 : i32, i32
  }
}

</mosaic_0001>

<bundles_post_ra>
// kernel: tpu_custom_call.1
= control target key start
LH: loop header
LB: loop body
LE: loop exit
PB: predicated region body
PF: predicated region fallthrough
CT: control target
= control target key end

     0   :  { %vm30_vm0 = vcmask 261120   ;;  %v787_v2 = vmov 0.0   ;;  %vm73_vm1 = vcmask 130048   ;;  %s788_s29 = smov 64   ;;  %s789_s30 = smov 32   ;;  %s940_s1 = inlined_call_operand.vmem [shape: bf16[16,128], index: 1, kind: input, shape index: {}]   ;;  %s941_s2 = inlined_call_operand.vmem [shape: bf16[32,128], index: 2, kind: input, shape index: {}]   ;;  %s942_s0 = inlined_call_operand.vmem [shape: bf16[64,16], index: 0, kind: input, shape index: {}]   ;;  %s943_s3 = inlined_call_operand.vmem [shape: f32[1,128], index: 3, kind: input, shape index: {}]   ;;  %s944_s4 = inlined_call_operand.vmem [shape: f32[1,32], index: 4, kind: input, shape index: {}]   ;;  %s945_s5 = inlined_call_operand.<no memory space> [shape: f32[1,1], index: 5, kind: input, shape index: {}]   ;;  %s946_s6 = inlined_call_operand.vmem [shape: f32[8,1], index: 6, kind: output, shape index: {}]  }
   0x1   :  { %v709_v0 = vld [vmem:[%s940_s1] sm:$0xff]  ;;  %v832_v1 = vld [vmem:[%s941_s2 + $0x8] sm:$0xff]  ;;  %31 = vst.msk [vmem:[#allocation2] sm:$0xff] %vm30_vm0, %v787_v2  ;;  %s790_s13 = smov 96  }
   0x2   :  { %v705_v3 = vld [vmem:[%s942_s0] sm:$0xff]  ;;  %32 = vst.msk [vmem:[#allocation3] sm:$0xff] %vm30_vm0, %v787_v2  ;;  %93 = vmatpush.bf16.msra.mxu0 %v709_v0  ;;  %144 = vmatpush.bf16.msra.mxu1 %v832_v1  ;;  %v706_v0 = vld [vmem:[%s942_s0 + $0x8] sm:$0xff] }
   0x3   :  { %v843_v4 = vld [vmem:[%s941_s2] sm:$0xff]  ;;  %206 = vmatpush.bf16.msra.mxu2 %v832_v1  ;;  %264 = vmatpush.bf16.msra.mxu3 %v832_v1 }
   0x4   :  { %v863_v7 = vld [vmem:[%s943_s3] ss:$0 sm:$0xff] }
   0x5   :  { %676 = vmatmul.msk.bf16.vlgmr.msra.gmra.mxu0 %vm73_vm1, %v705_v3 }
   0x6   :  { %145 = vmatpush.bf16.msra.mxu1 %v843_v4 }
   0x7   :  { %207 = vmatpush.bf16.msra.mxu2 %v843_v4  ;;  %265 = vmatpush.bf16.msra.mxu3 %v843_v4 }
   0x8   :  { %v119_v5 = vld [vmem:[#allocation2] sm:$0xff] }
   0x9   :  { %v121_v6 = vpack.c.bf16 %v119_v5, %v119_v5  ;;  %v120_v14 = vld [vmem:[#allocation3] sm:$0xff] }
   0xa   :  { %322 = vmatpush.bf16.msrb.mxu1 %v832_v1 }
   0xb   :  { %380 = vmatpush.bf16.msrb.mxu2 %v832_v1  ;;  %438 = vmatpush.bf16.msrb.mxu3 %v832_v1 }
   0xc   :  { %688 = vmatmul.msk.bf16.vlgmr.msra.gmra.mxu1 %vm30_vm0, %v121_v6 }
   0xe   :  { %323 = vmatpush.bf16.msrb.mxu1 %v843_v4 }
   0xf   :  { %381 = vmatpush.bf16.msrb.mxu2 %v843_v4  ;;  %439 = vmatpush.bf16.msrb.mxu3 %v843_v4 }
  0x12   :  { %496 = vmatpush.bf16.msra.mxu1 %v832_v1 }
  0x15   :  { %677 = vmatmul.msk.bf16.gmra.mxu0 %vm73_vm1, %v706_v0 }
  0x16   :  { %497 = vmatpush.bf16.msra.mxu1 %v843_v4 }
  0x82   :  { %v95_v8 = vpop.f32.mrf.mxu0 }
  0x83   :  { %v96_v9 = vadd.f32 %v863_v7, %v95_v8 }
  0x89   :  { %v147_v10 = vpop.f32.mrf.mxu1 }
  0x8a   :  { %v151_v11 = vadd.f32 %v147_v10, %v96_v9  ;;  %v97_v39 = vpop.f32.mrf.mxu0 }
  0x8b   :  { %v98_v40 = vadd.f32 %v863_v7, %v97_v39 }
  0x8c   :  { %719 = vtanh.f32 %v151_v11  ;;  %v689_v15 = vmul.f32 -1.442695, %v151_v11 }
  0x8e   :  { %721 = vpow2.f32 %v689_v15 }
  0x91   :  { %v149_v12 = vpop.f32.mrf.mxu1 }
  0x92   :  { %v720_v13 = vpop.eup %719  ;;  %v100_v5 = vpop.f32.mrf.mxu0 }
  0x93   :  { %178 = vrot.lane.b32.xlu0 %v720_v13, %s788_s29  ;;  %v101_v6 = vadd.f32 %v863_v7, %v100_v5 }
  0x94   :  { %v722_v16 = vpop.eup %721 }
  0x95   :  { %v155_v17 = vadd.f32 1.0, %v722_v16 }
  0x97   :  { %723 = vrcp.f32 %v155_v17  ;;  %v167_v23 = vand.u32 2147483648, %v155_v17  ;;  %vm161_vm3 = vweird.f32 %v155_v17  ;;  %v165_v24 = vand.u32 2147483647, %v155_v17 }
  0x99   :  { %v168_v26 = vor.u32 1.1754944e-38, %v167_v23  ;;  %vm166_vm5 = vcmp.eq.f32.partialorder %v165_v24, 8.507059e+37 }
  0x9b   :  { %173 = vrot.lane.b32.xlu0 %v120_v14, %s789_s30 }
  0x9d   :  { %v724_v18 = vpop.eup %723 }
  0x9e   :  { %v157_v19 = vmul.f32 %v724_v18, %v155_v17  ;;  %vm162_vm2 = vweird.f32 %v724_v18 }
  0x9f   :  { %vm163_vm4 = vmor %vm161_vm3, %vm162_vm2 }
  0xa0   :  { %v158_v20 = vsub.f32 1.0, %v157_v19 }
  0xa2   :  { %v159_v21 = vmul.f32 %v724_v18, %v158_v20 }
  0xa4   :  { %v160_v22 = vadd.f32 %v724_v18, %v159_v21 }
  0xa6   :  { %v164_v25 = vsel %vm163_vm4, %v724_v18, %v160_v22 }
  0xa7   :  { %v169_v28 = vsel %vm166_vm5, %v168_v26, %v164_v25 }
 0x105   :  { %v179_v27 = vpop.permute.xlu0 %178 }
 0x106   :  { %v181_v29 = vmul.f32 %v179_v27, %v169_v28 }
 0x108   :  { %183 = vrot.lane.b32.xlu1 %v181_v29, %s789_s30 }
 0x10d   :  { %v174_v30 = vpop.permute.xlu0 %173 }
 0x10e   :  { %v176_v31 = vmul.f32 %v174_v30, %v169_v28 }
 0x17a   :  { %v184_v32 = vpop.permute.xlu1 %183 }
 0x17b   :  { %v186_v33 = vadd.f32 %v184_v32, %v176_v31 }
 0x17d   :  { %725 = vtanh.f32 %v186_v33 }
 0x183   :  { %v726_v34 = vpop.eup %725 }
 0x184   :  { %189 = vrot.lane.b32.xlu1 %v726_v34, %s788_s29 }
 0x1f6   :  { %v190_v35 = vpop.permute.xlu1 %189 }
 0x1f7   :  { %v192_v36 = vmul.f32 %v190_v35, %v169_v28  ;;  %v102_v35 = vpop.f32.mrf.mxu0 }
 0x1f9   :  { %v193_v37 = vpack.c.bf16 %v192_v36, %v192_v36  ;;  %v103_v36 = vadd.f32 %v863_v7, %v102_v35 }
 0x1fb   :  { %195 = vrot.lane.b32.xlu2 %v193_v37, %s789_s30 }
 0x255   :  { %v196_v38 = vpop.permute.xlu2 %195 }
 0x256   :  { %690 = vmatmul.msk.bf16.vlgmr.msra.gmra.mxu2 %vm30_vm0, %v196_v38 }
 0x257   :  { %554 = vmatpush.bf16.msra.mxu2 %v832_v1 }
 0x25b   :  { %555 = vmatpush.bf16.msra.mxu2 %v843_v4 }
 0x2d9   :  { %v209_v41 = vpop.f32.mrf.mxu2 }
 0x2da   :  { %v213_v42 = vadd.f32 %v209_v41, %v98_v40 }
 0x2dc   :  { %727 = vtanh.f32 %v213_v42  ;;  %v691_v45 = vmul.f32 -1.442695, %v213_v42 }
 0x2de   :  { %729 = vpow2.f32 %v691_v45 }
 0x2e1   :  { %v211_v43 = vpop.f32.mrf.mxu2 }
 0x2e2   :  { %v728_v44 = vpop.eup %727 }
 0x2e3   :  { %236 = vrot.lane.b32.xlu2 %v728_v44, %s788_s29 }
 0x2e4   :  { %v730_v46 = vpop.eup %729 }
 0x2e5   :  { %v217_v47 = vadd.f32 1.0, %v730_v46 }
 0x2e7   :  { %731 = vrcp.f32 %v217_v47  ;;  %v229_v53 = vand.u32 2147483648, %v217_v47  ;;  %vm223_vm7 = vweird.f32 %v217_v47  ;;  %v227_v54 = vand.u32 2147483647, %v217_v47 }
 0x2e9   :  { %v230_v56 = vor.u32 1.1754944e-38, %v229_v53  ;;  %vm228_vm9 = vcmp.eq.f32.partialorder %v227_v54, 8.507059e+37 }
 0x2ed   :  { %v732_v48 = vpop.eup %731 }
 0x2ee   :  { %v219_v49 = vmul.f32 %v732_v48, %v217_v47  ;;  %vm224_vm6 = vweird.f32 %v732_v48 }
 0x2ef   :  { %vm225_vm8 = vmor %vm223_vm7, %vm224_vm6 }
 0x2f0   :  { %v220_v50 = vsub.f32 1.0, %v219_v49 }
 0x2f2   :  { %v221_v51 = vmul.f32 %v732_v48, %v220_v50 }
 0x2f4   :  { %v222_v52 = vadd.f32 %v732_v48, %v221_v51 }
 0x2f6   :  { %v226_v55 = vsel %vm225_vm8, %v732_v48, %v222_v52 }
 0x2f7   :  { %v231_v58 = vsel %vm228_vm9, %v230_v56, %v226_v55 }
 0x2f8   :  { %v234_v60 = vmul.f32 %v231_v58, %v186_v33 }
 0x33d   :  { %v237_v57 = vpop.permute.xlu2 %236 }
 0x33e   :  { %v239_v59 = vmul.f32 %v237_v57, %v231_v58 }
 0x340   :  { %241 = vrot.lane.b32.xlu0 %v239_v59, %s789_s30 }
 0x3b2   :  { %v242_v61 = vpop.permute.xlu0 %241 }
 0x3b3   :  { %v244_v62 = vadd.f32 %v242_v61, %v234_v60  ;;  %v707_v60 = vld [vmem:[%s942_s0 + $0x10] sm:$0xff] }
 0x3b4   :  { %678 = vmatmul.msk.bf16.gmra.mxu0 %vm73_vm1, %v707_v60 }
 0x3b5   :  { %733 = vtanh.f32 %v244_v62 }
 0x3bb   :  { %v734_v63 = vpop.eup %733 }
 0x3bc   :  { %247 = vrot.lane.b32.xlu1 %v734_v63, %s788_s29 }
 0x42e   :  { %v248_v1 = vpop.permute.xlu1 %247 }
 0x42f   :  { %v250_v2 = vmul.f32 %v248_v1, %v231_v58 }
 0x431   :  { %v251_v3 = vpack.c.bf16 %v250_v2, %v250_v2  ;;  %v105_v1 = vpop.f32.mrf.mxu0 }
 0x432   :  { %v106_v2 = vadd.f32 %v863_v7, %v105_v1 }
 0x433   :  { %253 = vrot.lane.b32.xlu2 %v251_v3, %s789_s30 }
 0x48d   :  { %v254_v4 = vpop.permute.xlu2 %253 }
 0x48e   :  { %692 = vmatmul.msk.bf16.vlgmr.msra.gmra.mxu3 %vm30_vm0, %v254_v4 }
 0x511   :  { %v267_v8 = vpop.f32.mrf.mxu3 }
 0x512   :  { %v271_v9 = vadd.f32 %v267_v8, %v101_v6 }
 0x514   :  { %735 = vtanh.f32 %v271_v9  ;;  %v693_v12 = vmul.f32 -1.442695, %v271_v9 }
 0x516   :  { %737 = vpow2.f32 %v693_v12 }
 0x519   :  { %v269_v10 = vpop.f32.mrf.mxu3 }
 0x51a   :  { %v736_v11 = vpop.eup %735 }
 0x51b   :  { %294 = vrot.lane.b32.xlu0 %v736_v11, %s788_s29 }
 0x51c   :  { %v738_v13 = vpop.eup %737 }
 0x51d   :  { %v275_v14 = vadd.f32 1.0, %v738_v13 }
 0x51f   :  { %739 = vrcp.f32 %v275_v14  ;;  %v287_v20 = vand.u32 2147483648, %v275_v14  ;;  %vm281_vm11 = vweird.f32 %v275_v14  ;;  %v285_v21 = vand.u32 2147483647, %v275_v14 }
 0x521   :  { %v288_v23 = vor.u32 1.1754944e-38, %v287_v20  ;;  %vm286_vm13 = vcmp.eq.f32.partialorder %v285_v21, 8.507059e+37 }
 0x525   :  { %v740_v15 = vpop.eup %739 }
 0x526   :  { %v277_v16 = vmul.f32 %v740_v15, %v275_v14  ;;  %vm282_vm10 = vweird.f32 %v740_v15 }
 0x527   :  { %vm283_vm12 = vmor %vm281_vm11, %vm282_vm10 }
 0x528   :  { %v278_v17 = vsub.f32 1.0, %v277_v16 }
 0x52a   :  { %v279_v18 = vmul.f32 %v740_v15, %v278_v17 }
 0x52c   :  { %v280_v19 = vadd.f32 %v740_v15, %v279_v18 }
 0x52e   :  { %v284_v22 = vsel %vm283_vm12, %v740_v15, %v280_v19 }
 0x52f   :  { %v289_v25 = vsel %vm286_vm13, %v288_v23, %v284_v22 }
 0x530   :  { %v292_v27 = vmul.f32 %v289_v25, %v244_v62 }
 0x58d   :  { %v295_v24 = vpop.permute.xlu0 %294 }
 0x58e   :  { %v297_v26 = vmul.f32 %v295_v24, %v289_v25 }
 0x590   :  { %299 = vrot.lane.b32.xlu1 %v297_v26, %s789_s30 }
 0x602   :  { %v300_v28 = vpop.permute.xlu1 %299 }
 0x603   :  { %v302_v29 = vadd.f32 %v300_v28, %v292_v27 }
 0x605   :  { %741 = vtanh.f32 %v302_v29 }
 0x60b   :  { %v742_v30 = vpop.eup %741 }
 0x60c   :  { %305 = vrot.lane.b32.xlu2 %v742_v30, %s788_s29 }
 0x666   :  { %v306_v31 = vpop.permute.xlu2 %305 }
 0x667   :  { %v308_v32 = vmul.f32 %v306_v31, %v289_v25  ;;  %v107_v31 = vpop.f32.mrf.mxu0 }
 0x669   :  { %v309_v33 = vpack.c.bf16 %v308_v32, %v308_v32  ;;  %v108_v32 = vadd.f32 %v863_v7, %v107_v31 }
 0x66b   :  { %311 = vrot.lane.b32.xlu0 %v309_v33, %s789_s30 }
 0x6dd   :  { %v312_v34 = vpop.permute.xlu0 %311 }
 0x6de   :  { %694 = vmatmul.msk.bf16.vlgmr.msrb.gmra.mxu1 %vm30_vm0, %v312_v34 }
 0x75b   :  { %v325_v37 = vpop.f32.mrf.mxu1 }
 0x75c   :  { %v329_v38 = vadd.f32 %v325_v37, %v103_v36 }
 0x75e   :  { %743 = vtanh.f32 %v329_v38  ;;  %v695_v41 = vmul.f32 -1.442695, %v329_v38 }
 0x760   :  { %745 = vpow2.f32 %v695_v41 }
 0x763   :  { %v327_v39 = vpop.f32.mrf.mxu1 }
 0x764   :  { %v744_v40 = vpop.eup %743 }
 0x765   :  { %352 = vrot.lane.b32.xlu1 %v744_v40, %s788_s29 }
 0x766   :  { %v746_v42 = vpop.eup %745 }
 0x767   :  { %v333_v43 = vadd.f32 1.0, %v746_v42 }
 0x769   :  { %747 = vrcp.f32 %v333_v43  ;;  %v345_v49 = vand.u32 2147483648, %v333_v43  ;;  %vm339_vm15 = vweird.f32 %v333_v43  ;;  %v343_v50 = vand.u32 2147483647, %v333_v43 }
 0x76b   :  { %v346_v52 = vor.u32 1.1754944e-38, %v345_v49  ;;  %vm344_vm3 = vcmp.eq.f32.partialorder %v343_v50, 8.507059e+37 }
 0x76f   :  { %v748_v44 = vpop.eup %747 }
 0x770   :  { %v335_v45 = vmul.f32 %v748_v44, %v333_v43  ;;  %vm340_vm14 = vweird.f32 %v748_v44 }
 0x771   :  { %vm341_vm2 = vmor %vm339_vm15, %vm340_vm14 }
 0x772   :  { %v336_v46 = vsub.f32 1.0, %v335_v45 }
 0x774   :  { %v337_v47 = vmul.f32 %v748_v44, %v336_v46 }
 0x776   :  { %v338_v48 = vadd.f32 %v748_v44, %v337_v47 }
 0x778   :  { %v342_v51 = vsel %vm341_vm2, %v748_v44, %v338_v48 }
 0x779   :  { %v347_v54 = vsel %vm344_vm3, %v346_v52, %v342_v51 }
 0x77a   :  { %v350_v56 = vmul.f32 %v347_v54, %v302_v29 }
 0x7d7   :  { %v353_v53 = vpop.permute.xlu1 %352 }
 0x7d8   :  { %v355_v55 = vmul.f32 %v353_v53, %v347_v54 }
 0x7da   :  { %357 = vrot.lane.b32.xlu2 %v355_v55, %s789_s30 }
 0x834   :  { %v358_v57 = vpop.permute.xlu2 %357 }
 0x835   :  { %v360_v58 = vadd.f32 %v358_v57, %v350_v56  ;;  %v708_v56 = vld [vmem:[%s942_s0 + $0x18] sm:$0xff] }
 0x836   :  { %679 = vmatmul.msk.bf16.gmra.mxu0 %vm73_vm1, %v708_v56 }
 0x837   :  { %749 = vtanh.f32 %v360_v58 }
 0x83d   :  { %v750_v59 = vpop.eup %749 }
 0x83e   :  { %363 = vrot.lane.b32.xlu0 %v750_v59, %s788_s29 }
 0x8b0   :  { %v364_v61 = vpop.permute.xlu0 %363 }
 0x8b1   :  { %v366_v62 = vmul.f32 %v364_v61, %v347_v54 }
 0x8b3   :  { %v367_v63 = vpack.c.bf16 %v366_v62, %v366_v62  ;;  %v110_v61 = vpop.f32.mrf.mxu0 }
 0x8b4   :  { %v111_v62 = vadd.f32 %v863_v7, %v110_v61 }
 0x8b5   :  { %369 = vrot.lane.b32.xlu1 %v367_v63, %s789_s30 }
 0x927   :  { %v370_v0 = vpop.permute.xlu1 %369 }
 0x928   :  { %696 = vmatmul.msk.bf16.vlgmr.msrb.gmra.mxu2 %vm30_vm0, %v370_v0 }
 0x9ab   :  { %v383_v3 = vpop.f32.mrf.mxu2 }
 0x9ac   :  { %v387_v4 = vadd.f32 %v383_v3, %v106_v2 }
 0x9ae   :  { %751 = vtanh.f32 %v387_v4  ;;  %v697_v8 = vmul.f32 -1.442695, %v387_v4 }
 0x9b0   :  { %753 = vpow2.f32 %v697_v8 }
 0x9b3   :  { %v385_v5 = vpop.f32.mrf.mxu2 }
 0x9b4   :  { %v752_v6 = vpop.eup %751 }
 0x9b5   :  { %410 = vrot.lane.b32.xlu2 %v752_v6, %s788_s29 }
 0x9b6   :  { %v754_v9 = vpop.eup %753 }
 0x9b7   :  { %v391_v10 = vadd.f32 1.0, %v754_v9 }
 0x9b9   :  { %755 = vrcp.f32 %v391_v10  ;;  %v403_v16 = vand.u32 2147483648, %v391_v10  ;;  %vm397_vm5 = vweird.f32 %v391_v10  ;;  %v401_v17 = vand.u32 2147483647, %v391_v10 }
 0x9bb   :  { %v404_v19 = vor.u32 1.1754944e-38, %v403_v16  ;;  %vm402_vm7 = vcmp.eq.f32.partialorder %v401_v17, 8.507059e+37 }
 0x9bf   :  { %v756_v11 = vpop.eup %755 }
 0x9c0   :  { %v393_v12 = vmul.f32 %v756_v11, %v391_v10  ;;  %vm398_vm4 = vweird.f32 %v756_v11 }
 0x9c1   :  { %vm399_vm6 = vmor %vm397_vm5, %vm398_vm4 }
 0x9c2   :  { %v394_v13 = vsub.f32 1.0, %v393_v12 }
 0x9c4   :  { %v395_v14 = vmul.f32 %v756_v11, %v394_v13 }
 0x9c6   :  { %v396_v15 = vadd.f32 %v756_v11, %v395_v14 }
 0x9c8   :  { %v400_v18 = vsel %vm399_vm6, %v756_v11, %v396_v15 }
 0x9c9   :  { %v405_v21 = vsel %vm402_vm7, %v404_v19, %v400_v18  ;;  %vm650_vm7 = vcmask 7168  }
 0x9ca   :  { %v408_v23 = vmul.f32 %v405_v21, %v360_v58 }
 0xa0f   :  { %v411_v20 = vpop.permute.xlu2 %410 }
 0xa10   :  { %v413_v22 = vmul.f32 %v411_v20, %v405_v21 }
 0xa12   :  { %415 = vrot.lane.b32.xlu0 %v413_v22, %s789_s30 }
 0xa84   :  { %v416_v24 = vpop.permute.xlu0 %415 }
 0xa85   :  { %v418_v25 = vadd.f32 %v416_v24, %v408_v23 }
 0xa87   :  { %757 = vtanh.f32 %v418_v25 }
 0xa8d   :  { %v758_v26 = vpop.eup %757 }
 0xa8e   :  { %421 = vrot.lane.b32.xlu1 %v758_v26, %s788_s29 }
 0xb00   :  { %v422_v27 = vpop.permute.xlu1 %421 }
 0xb01   :  { %v424_v28 = vmul.f32 %v422_v27, %v405_v21  ;;  %v112_v27 = vpop.f32.mrf.mxu0 }
 0xb03   :  { %v425_v29 = vpack.c.bf16 %v424_v28, %v424_v28  ;;  %v113_v28 = vadd.f32 %v863_v7, %v112_v27 }
 0xb05   :  { %427 = vrot.lane.b32.xlu2 %v425_v29, %s789_s30 }
 0xb5f   :  { %v428_v30 = vpop.permute.xlu2 %427 }
 0xb60   :  { %698 = vmatmul.msk.bf16.vlgmr.msrb.gmra.mxu3 %vm30_vm0, %v428_v30 }
 0xbe3   :  { %v441_v33 = vpop.f32.mrf.mxu3 }
 0xbe4   :  { %v445_v34 = vadd.f32 %v441_v33, %v108_v32 }
 0xbe6   :  { %759 = vtanh.f32 %v445_v34  ;;  %v699_v37 = vmul.f32 -1.442695, %v445_v34 }
 0xbe8   :  { %761 = vpow2.f32 %v699_v37 }
 0xbeb   :  { %v443_v35 = vpop.f32.mrf.mxu3 }
 0xbec   :  { %v760_v36 = vpop.eup %759 }
 0xbed   :  { %468 = vrot.lane.b32.xlu0 %v760_v36, %s788_s29 }
 0xbee   :  { %v762_v38 = vpop.eup %761 }
 0xbef   :  { %v449_v39 = vadd.f32 1.0, %v762_v38 }
 0xbf1   :  { %763 = vrcp.f32 %v449_v39  ;;  %v461_v45 = vand.u32 2147483648, %v449_v39  ;;  %vm455_vm9 = vweird.f32 %v449_v39  ;;  %v459_v46 = vand.u32 2147483647, %v449_v39 }
 0xbf3   :  { %v462_v48 = vor.u32 1.1754944e-38, %v461_v45  ;;  %vm460_vm11 = vcmp.eq.f32.partialorder %v459_v46, 8.507059e+37 }
 0xbf7   :  { %v764_v40 = vpop.eup %763 }
 0xbf8   :  { %v451_v41 = vmul.f32 %v764_v40, %v449_v39  ;;  %vm456_vm8 = vweird.f32 %v764_v40 }
 0xbf9   :  { %vm457_vm10 = vmor %vm455_vm9, %vm456_vm8 }
 0xbfa   :  { %v452_v42 = vsub.f32 1.0, %v451_v41 }
 0xbfc   :  { %v453_v43 = vmul.f32 %v764_v40, %v452_v42 }
 0xbfe   :  { %v454_v44 = vadd.f32 %v764_v40, %v453_v43 }
 0xc00   :  { %v458_v47 = vsel %vm457_vm10, %v764_v40, %v454_v44 }
 0xc01   :  { %v463_v50 = vsel %vm460_vm11, %v462_v48, %v458_v47  ;;  %v717_v47 = vld [vmem:[%s944_s4] ss:$0 sm:$0xff] }
 0xc02   :  { %v466_v52 = vmul.f32 %v463_v50, %v418_v25 }
 0xc5f   :  { %v469_v49 = vpop.permute.xlu0 %468 }
 0xc60   :  { %v471_v51 = vmul.f32 %v469_v49, %v463_v50 }
 0xc62   :  { %473 = vrot.lane.b32.xlu1 %v471_v51, %s789_s30 }
 0xcd4   :  { %v474_v53 = vpop.permute.xlu1 %473 }
 0xcd5   :  { %v476_v54 = vadd.f32 %v474_v53, %v466_v52 }
 0xcd7   :  { %765 = vtanh.f32 %v476_v54 }
 0xcdd   :  { %v766_v55 = vpop.eup %765 }
 0xcde   :  { %479 = vrot.lane.b32.xlu2 %v766_v55, %s788_s29 }
 0xd38   :  { %v480_v57 = vpop.permute.xlu2 %479 }
 0xd39   :  { %v482_v58 = vmul.f32 %v480_v57, %v463_v50  ;;  %v11_v57 = vstv %s945_s5 }
 0xd3a   :  { %12 = vst [vmem:[#allocation4] sm:$0x1] %v11_v57 }
 0xd3b   :  { %v483_v59 = vpack.c.bf16 %v482_v58, %v482_v58 }
 0xd3d   :  { %485 = vrot.lane.b32.xlu0 %v483_v59, %s789_s30 }
 0xd41   :  { %v718_v61 = vld [vmem:[#allocation4] ss:$0 sm:$0xff] }
 0xdaf   :  { %v486_v60 = vpop.permute.xlu0 %485 }
 0xdb0   :  { %700 = vmatmul.msk.bf16.vlgmr.msra.gmra.mxu1 %vm30_vm0, %v486_v60 }
 0xe2d   :  { %v499_v63 = vpop.f32.mrf.mxu1 }
 0xe2e   :  { %v503_v0 = vadd.f32 %v499_v63, %v111_v62 }
 0xe30   :  { %767 = vtanh.f32 %v503_v0  ;;  %v701_v3 = vmul.f32 -1.442695, %v503_v0 }
 0xe32   :  { %769 = vpow2.f32 %v701_v3 }
 0xe35   :  { %v501_v1 = vpop.f32.mrf.mxu1 }
 0xe36   :  { %v768_v2 = vpop.eup %767 }
 0xe37   :  { %526 = vrot.lane.b32.xlu1 %v768_v2, %s788_s29 }
 0xe38   :  { %v770_v4 = vpop.eup %769 }
 0xe39   :  { %v507_v5 = vadd.f32 1.0, %v770_v4 }
 0xe3b   :  { %771 = vrcp.f32 %v507_v5  ;;  %v519_v12 = vand.u32 2147483648, %v507_v5  ;;  %vm513_vm12 = vweird.f32 %v507_v5  ;;  %v517_v13 = vand.u32 2147483647, %v507_v5 }
 0xe3d   :  { %v520_v15 = vor.u32 1.1754944e-38, %v519_v12  ;;  %vm518_vm14 = vcmp.eq.f32.partialorder %v517_v13, 8.507059e+37 }
 0xe41   :  { %v772_v6 = vpop.eup %771 }
 0xe42   :  { %v509_v8 = vmul.f32 %v772_v6, %v507_v5  ;;  %vm514_vm1 = vweird.f32 %v772_v6 }
 0xe43   :  { %vm515_vm13 = vmor %vm513_vm12, %vm514_vm1 }
 0xe44   :  { %v510_v9 = vsub.f32 1.0, %v509_v8 }
 0xe46   :  { %v511_v10 = vmul.f32 %v772_v6, %v510_v9 }
 0xe48   :  { %v512_v11 = vadd.f32 %v772_v6, %v511_v10 }
 0xe4a   :  { %v516_v14 = vsel %vm515_vm13, %v772_v6, %v512_v11 }
 0xe4b   :  { %v521_v17 = vsel %vm518_vm14, %v520_v15, %v516_v14 }
 0xe4c   :  { %v524_v19 = vmul.f32 %v521_v17, %v476_v54 }
 0xea9   :  { %v527_v16 = vpop.permute.xlu1 %526 }
 0xeaa   :  { %v529_v18 = vmul.f32 %v527_v16, %v521_v17 }
 0xeac   :  { %531 = vrot.lane.b32.xlu2 %v529_v18, %s789_s30 }
 0xf06   :  { %v532_v20 = vpop.permute.xlu2 %531 }
 0xf07   :  { %v534_v21 = vadd.f32 %v532_v20, %v524_v19 }
 0xf09   :  { %773 = vtanh.f32 %v534_v21 }
 0xf0f   :  { %v774_v22 = vpop.eup %773 }
 0xf10   :  { %537 = vrot.lane.b32.xlu0 %v774_v22, %s788_s29 }
 0xf82   :  { %v538_v23 = vpop.permute.xlu0 %537 }
 0xf83   :  { %v540_v24 = vmul.f32 %v538_v23, %v521_v17 }
 0xf85   :  { %v541_v25 = vpack.c.bf16 %v540_v24, %v540_v24 }
 0xf87   :  { %543 = vrot.lane.b32.xlu1 %v541_v25, %s789_s30 }
 0xff9   :  { %v544_v26 = vpop.permute.xlu1 %543 }
 0xffa   :  { %702 = vmatmul.msk.bf16.vlgmr.msra.gmra.mxu2 %vm30_vm0, %v544_v26 }
0x107d   :  { %v557_v29 = vpop.f32.mrf.mxu2 }
0x107e   :  { %v561_v30 = vadd.f32 %v557_v29, %v113_v28 }
0x1080   :  { %775 = vtanh.f32 %v561_v30  ;;  %v703_v33 = vmul.f32 -1.442695, %v561_v30 }
0x1082   :  { %777 = vpow2.f32 %v703_v33 }
0x1085   :  { %v559_v31 = vpop.f32.mrf.mxu2 }
0x1086   :  { %v776_v32 = vpop.eup %775 }
0x1087   :  { %584 = vrot.lane.b32.xlu2 %v776_v32, %s788_s29 }
0x1088   :  { %v778_v34 = vpop.eup %777 }
0x1089   :  { %v565_v35 = vadd.f32 1.0, %v778_v34 }
0x108b   :  { %779 = vrcp.f32 %v565_v35  ;;  %v577_v41 = vand.u32 2147483648, %v565_v35  ;;  %vm571_vm2 = vweird.f32 %v565_v35  ;;  %v575_v7 = vand.u32 2147483647, %v565_v35 }
0x108d   :  { %v578_v43 = vor.u32 1.1754944e-38, %v577_v41  ;;  %vm576_vm4 = vcmp.eq.f32.partialorder %v575_v7, 8.507059e+37 }
0x108f   :  { %615 = vrot.lane.b32.xlu2 %v717_v47, %s790_s13 }
0x1091   :  { %v780_v36 = vpop.eup %779 }
0x1092   :  { %v567_v37 = vmul.f32 %v780_v36, %v565_v35  ;;  %vm572_vm15 = vweird.f32 %v780_v36 }
0x1093   :  { %vm573_vm3 = vmor %vm571_vm2, %vm572_vm15 }
0x1094   :  { %v568_v38 = vsub.f32 1.0, %v567_v37 }
0x1096   :  { %v569_v39 = vmul.f32 %v780_v36, %v568_v38 }
0x1098   :  { %v570_v40 = vadd.f32 %v780_v36, %v569_v39 }
0x109a   :  { %v574_v42 = vsel %vm573_vm3, %v780_v36, %v570_v40 }
0x109b   :  { %v579_v45 = vsel %vm576_vm4, %v578_v43, %v574_v42 }
0x109c   :  { %v582_v48 = vmul.f32 %v579_v45, %v534_v21 }
0x10e1   :  { %v585_v44 = vpop.permute.xlu2 %584 }
0x10e2   :  { %v587_v46 = vmul.f32 %v585_v44, %v579_v45 }
0x10e4   :  { %589 = vrot.lane.b32.xlu0 %v587_v46, %s789_s30 }
0x10e9   :  { %v616_v53 = vpop.permute.xlu2 %615 }
0x1156   :  { %v590_v49 = vpop.permute.xlu0 %589 }
0x1157   :  { %v592_v50 = vadd.f32 %v590_v49, %v582_v48 }
0x1159   :  { %781 = vtanh.f32 %v592_v50 }
0x115f   :  { %v782_v51 = vpop.eup %781 }
0x1160   :  { %595 = vrot.lane.b32.xlu1 %v782_v51, %s788_s29 }
0x11d2   :  { %v596_v52 = vpop.permute.xlu1 %595 }
0x11d3   :  { %v598_v54 = vmul.f32 %v596_v52, %v579_v45 }
0x11d5   :  { %v618_v55 = vmul.f32 %v616_v53, %v598_v54  ;;  %600 = vrot.lane.b32.xlu2 %v598_v54, %s789_s30 }
0x11d7   :  { %620 = vrot.lane.b32.xlu0 %v618_v55, %s789_s30 }
0x11df   :  { %605 = vrot.lane.b32.xlu0 %v592_v50, %s790_s13 }
0x122f   :  { %v601_v56 = vpop.permute.xlu2 %600 }
0x1230   :  { %603 = vst.msk [vmem:[#allocation2] sm:$0xff] %vm30_vm0, %v601_v56 }
0x1249   :  { %v621_v58 = vpop.permute.xlu0 %620 }
0x124a   :  { %v623_v59 = vsel %vm30_vm0, %v621_v58, 0.0 }
0x124b   :  { %624 = vadd.xlane.f32.xlu1 %v623_v59 }
0x1251   :  { %v606_v60 = vpop.permute.xlu0 %605 }
0x1252   :  { %608 = vst.msk [vmem:[#allocation3] sm:$0xff] %vm30_vm0, %v606_v60 }
0x12be   :  { %v625_v62 = vpop.xlane.xlu1 %624 }
0x12bf   :  { %v630_v63 = vadd.f32 %v718_v61, %v625_v62 }
0x12c1   :  { %v704_v0 = vmul.f32 -1.442695, %v630_v63 }
0x12c3   :  { %783 = vpow2.f32 %v704_v0 }
0x12c9   :  { %v784_v1 = vpop.eup %783 }
0x12ca   :  { %v634_v2 = vadd.f32 1.0, %v784_v1 }
0x12cc   :  { %785 = vrcp.f32 %v634_v2  ;;  %v646_v6 = vand.u32 2147483648, %v634_v2  ;;  %v644_v9 = vand.u32 2147483647, %v634_v2  ;;  %vm640_vm6 = vweird.f32 %v634_v2 }
0x12ce   :  { %v647_v11 = vor.u32 1.1754944e-38, %v646_v6  ;;  %vm645_vm0 = vcmp.eq.f32.partialorder %v644_v9, 8.507059e+37 }
0x12d2   :  { %v786_v3 = vpop.eup %785 }
0x12d3   :  { %v636_v4 = vmul.f32 %v786_v3, %v634_v2  ;;  %vm641_vm5 = vweird.f32 %v786_v3 }
0x12d4   :  { %vm642_vm8 = vmor %vm640_vm6, %vm641_vm5 }
0x12d5   :  { %v637_v5 = vsub.f32 1.0, %v636_v4 }
0x12d7   :  { %v638_v8 = vmul.f32 %v786_v3, %v637_v5 }
0x12d9   :  { %v639_v10 = vadd.f32 %v786_v3, %v638_v8 }
0x12db   :  { %v643_v12 = vsel %vm642_vm8, %v786_v3, %v639_v10 }
0x12dc   :  { %v648_v13 = vsel %vm645_vm0, %v647_v11, %v643_v12 }
0x12dd   :  { %651 = vst.msk [vmem:[%s946_s6] sm:$0xff] %vm650_vm7, %v648_v13 }

</bundles_post_ra>
